<compile_context>
chip_gen: v5e
topology: v5e:2x2
jax: 0.10.0
libtpu: 0.0.40
codegen_flags: <defaults>
</compile_context>

<pallas_src>
import functools

import jax
import jax.numpy as jnp
from jax.experimental import pallas as pl
from jax.experimental.pallas import tpu as pltpu


def _sdpa_compute(q_ref, k_ref, v_ref, m_ref, inv_temperature):
    q = q_ref[0]                       # (G,  Lq, D)   bf16
    k = k_ref[0]                       # (G,  Lk, D)   bf16
    v = v_ref[0]                       # (G,  Lk, D)   bf16
    keep = m_ref[0].astype(jnp.float32)  # (Gm, Lq, Lk) (Gm in {1, G}); !=0 -> keep

    # scores = (q @ k^T) / temperature -- contract over D, batch over packed heads,
    # bf16 operands, f32 MXU accumulation, no explicit transpose of k.
    scores = jax.lax.dot_general(
        q, k,
        dimension_numbers=(((2,), (2,)), ((0,), (0,))),
        preferred_element_type=jnp.float32,
    ) * jnp.float32(inv_temperature)                        # (G, Lq, Lk) f32

    # masked_fill(mask == 0, -1e9)
    scores = jnp.where(keep == 0.0, jnp.float32(-1000000000.0), scores)

    # numerically stable softmax over the last dim (f32)
    row_max = jnp.max(scores, axis=-1, keepdims=True)
    e = jnp.exp(scores - row_max)
    denom = jnp.sum(e, axis=-1, keepdims=True)
    attn = e * pl.reciprocal(denom, approx=True)            # (G, Lq, Lk) f32

    # output = attn @ v (bf16 operands, f32 accumulation)
    out = jax.lax.dot_general(
        attn.astype(v.dtype), v,
        dimension_numbers=(((2,), (1,)), ((0,), (0,))),
        preferred_element_type=jnp.float32,
    )                                                       # (G, Lq, D) f32
    return out, attn


def _sdpa_kernel_with_attn(q_ref, k_ref, v_ref, m_ref, out_ref, attn_ref, *,
                           inv_temperature):
    out, attn = _sdpa_compute(q_ref, k_ref, v_ref, m_ref, inv_temperature)
    out_ref[0] = out.astype(out_ref.dtype)
    attn_ref[0] = attn.astype(attn_ref.dtype)


def _sdpa_kernel_no_attn(q_ref, k_ref, v_ref, m_ref, out_ref, *, inv_temperature):
    out, _ = _sdpa_compute(q_ref, k_ref, v_ref, m_ref, inv_temperature)
    out_ref[0] = out.astype(out_ref.dtype)


def scaled_dot_product_attention(q, k, v, temperature, mask=None, *,
                                 return_attn=True, heads_per_block=None):
    """q, k, v: (B, H, L, D). mask broadcastable to (B, H, Lq, Lk) or None.

    Returns (output, attn) if return_attn else output (eval mode, no dropout).
    """
    B, H, Lq, D = q.shape
    Lk = k.shape[2]

    # --- mask: keep the smallest broadcast form, stored as int8 -------------
    if mask is None:
        mfull = jnp.ones((1, 1, Lq, Lk), dtype=jnp.int8)
    else:
        m = jnp.asarray(mask)
        while m.ndim < 4:
            m = m[None]
        assert m.shape[0] in (1, B) and m.shape[1] in (1, H), \
            "mask must broadcast over (B, H)"
        mfull = jnp.broadcast_to(m != 0, (m.shape[0], m.shape[1], Lq, Lk)
                                 ).astype(jnp.int8)
    Bm, Hm = mfull.shape[0], mfull.shape[1]

    # --- pack as many heads per grid step as fit a conservative VMEM budget --
    if heads_per_block is None:
        budget = 20 * 1024 * 1024  # headroom under default scoped-VMEM limits

        def step_bytes(g):
            nbytes = 2 * g * (Lq + 2 * Lk) * D * 2          # q,k,v bf16, double-buffered
            nbytes += 2 * g * Lq * D * 4                    # out f32, double-buffered
            if return_attn:
                nbytes += 2 * g * Lq * Lk * 4               # attn f32, double-buffered
            nbytes += 2 * g * Lq * Lk * 4                   # scores/exp intermediates
            return nbytes

        G = H
        while G > 1 and (H % G != 0 or step_bytes(G) > budget):
            G -= 1
    else:
        G = heads_per_block
    assert H % G == 0, "heads_per_block must divide H"
    Gm = G if Hm == H else 1

    qb = q.astype(jnp.bfloat16)
    kb = k.astype(jnp.bfloat16)
    vb = v.astype(jnp.bfloat16)

    def qkv_map(b, h):
        return (b, h, 0, 0)

    def mask_map(b, h):
        # Constant block index along broadcast axes -> mask stays VMEM-resident.
        return (b if Bm != 1 else 0, h if Hm != 1 else 0, 0, 0)

    in_specs = [
        pl.BlockSpec((1, G, Lq, D), qkv_map),
        pl.BlockSpec((1, G, Lk, D), qkv_map),
        pl.BlockSpec((1, G, Lk, D), qkv_map),
        pl.BlockSpec((1, Gm, Lq, Lk), mask_map),
    ]
    out_spec = pl.BlockSpec((1, G, Lq, D), qkv_map)

    inv_temperature = 1.0 / float(temperature)
    if return_attn:
        kernel = functools.partial(_sdpa_kernel_with_attn,
                                   inv_temperature=inv_temperature)
        out_shape = (jax.ShapeDtypeStruct((B, H, Lq, D), jnp.float32),
                     jax.ShapeDtypeStruct((B, H, Lq, Lk), jnp.float32))
        out_specs = (out_spec, pl.BlockSpec((1, G, Lq, Lk), qkv_map))
    else:
        kernel = functools.partial(_sdpa_kernel_no_attn,
                                   inv_temperature=inv_temperature)
        out_shape = jax.ShapeDtypeStruct((B, H, Lq, D), jnp.float32)
        out_specs = out_spec

    return pl.pallas_call(
        kernel,
        out_shape=out_shape,
        grid_spec=pltpu.PrefetchScalarGridSpec(
            num_scalar_prefetch=0,
            grid=(B, H // G),
            in_specs=in_specs,
            out_specs=out_specs,
        ),
        compiler_params=pltpu.CompilerParams(
            dimension_semantics=("parallel", "parallel"),
            vmem_limit_bytes=32 * 1024 * 1024,
        ),
    )(qb, kb, vb, mfull)


def _reference(q, k, v, temperature, mask=None):
    attn = jnp.einsum("bhqd,bhkd->bhqk", q / temperature, k)
    if mask is not None:
        attn = jnp.where(mask == 0, -1000000000.0, attn)
    attn = jax.nn.softmax(attn, axis=-1)
    out = jnp.einsum("bhqk,bhkd->bhqd", attn, v)
    return out, attn


if __name__ == "__main__":
    B, H, L, D = 2, 4, 8, 32
    temperature = float(D) ** 0.5

    key = jax.random.PRNGKey(0)
    kq, kk, kv = jax.random.split(key, 3)
    q = jax.random.normal(kq, (B, H, L, D), dtype=jnp.float32)
    k = jax.random.normal(kk, (B, H, L, D), dtype=jnp.float32)
    v = jax.random.normal(kv, (B, H, L, D), dtype=jnp.float32)

    # Causal-style mask broadcast over batch and heads (mask==0 -> -1e9).
    mask = jnp.tril(jnp.ones((L, L), dtype=jnp.float32))[None, None, :, :]

    # Full path (matches the PyTorch module: returns (output, attn)).
    out, attn = scaled_dot_product_attention(q, k, v, temperature, mask,
                                             return_attn=True)
    out = jax.block_until_ready(out)
    attn = jax.block_until_ready(attn)

    # Fast path: no attn writeback.
    out_fast = scaled_dot_product_attention(q, k, v, temperature, mask,
                                            return_attn=False)
    out_fast = jax.block_until_ready(out_fast)

    # No-mask path.
    out_nm, attn_nm = scaled_dot_product_attention(q, k, v, temperature, None,
                                                   return_attn=True)
    out_nm = jax.block_until_ready(out_nm)

    out_ref, attn_ref = _reference(q, k, v, temperature, mask)
    out_ref_nm, attn_ref_nm = _reference(q, k, v, temperature, None)

    # bf16 MXU operands => looser tolerances than a pure-f32 comparison.
    assert jnp.allclose(out, out_ref, atol=1e-1, rtol=5e-2), "output mismatch"
    assert jnp.allclose(attn, attn_ref, atol=5e-2, rtol=5e-2), "attn mismatch"
    assert jnp.allclose(out_fast, out, atol=1e-5, rtol=1e-5), "return_attn=False mismatch"
    assert jnp.allclose(out_nm, out_ref_nm, atol=1e-1, rtol=5e-2), "no-mask output mismatch"
    assert jnp.allclose(attn_nm, attn_ref_nm, atol=5e-2, rtol=5e-2), "no-mask attn mismatch"

    print("KERNEL_OK")
</pallas_src>

<mosaic_0001>
module attributes {stable_mosaic.version = 11 : i64} {
  func.func @_sdpa_kernel_with_attn(%arg0: i32, %arg1: i32, %arg2: memref<1x4x8x32xbf16, #tpu.memory_space<vmem>>, %arg3: memref<1x4x8x32xbf16, #tpu.memory_space<vmem>>, %arg4: memref<1x4x8x32xbf16, #tpu.memory_space<vmem>>, %arg5: memref<1x1x8x8xi8, #tpu.memory_space<vmem>>, %arg6: memref<1x4x8x32xf32, #tpu.memory_space<vmem>>, %arg7: memref<1x4x8x8xf32, #tpu.memory_space<vmem>>) attributes {dimension_semantics = [#tpu.dimension_semantics<parallel>, #tpu.dimension_semantics<parallel>], iteration_bounds = array<i64: 2, 1>, scalar_prefetch = 0 : i64, scratch_operands = 0 : i64, tpu.core_type = #tpu.core_type<tc>, window_params = [{transform_indices = @transform_0, window_bounds = array<i64: 1, 4, 8, 32>}, {transform_indices = @transform_1, window_bounds = array<i64: 1, 4, 8, 32>}, {transform_indices = @transform_2, window_bounds = array<i64: 1, 4, 8, 32>}, {pipeline_mode = #tpu.pipeline_mode<synchronous>, transform_indices = @transform_3, window_bounds = array<i64: 1, 1, 8, 8>}, {transform_indices = @transform_4, window_bounds = array<i64: 1, 4, 8, 32>}, {transform_indices = @transform_5, window_bounds = array<i64: 1, 4, 8, 8>}]} {
    %c0 = arith.constant 0 : index
    %c0_0 = arith.constant 0 : index
    %c0_1 = arith.constant 0 : index
    %c0_2 = arith.constant 0 : index
    %0 = vector.load %arg2[%c0, %c0_0, %c0_1, %c0_2] : memref<1x4x8x32xbf16, #tpu.memory_space<vmem>>, vector<1x4x8x32xbf16>
    %1 = vector.shape_cast %0 : vector<1x4x8x32xbf16> to vector<4x8x32xbf16>
    %c0_3 = arith.constant 0 : index
    %c0_4 = arith.constant 0 : index
    %c0_5 = arith.constant 0 : index
    %c0_6 = arith.constant 0 : index
    %2 = vector.load %arg3[%c0_3, %c0_4, %c0_5, %c0_6] : memref<1x4x8x32xbf16, #tpu.memory_space<vmem>>, vector<1x4x8x32xbf16>
    %3 = vector.shape_cast %2 : vector<1x4x8x32xbf16> to vector<4x8x32xbf16>
    %c0_7 = arith.constant 0 : index
    %c0_8 = arith.constant 0 : index
    %c0_9 = arith.constant 0 : index
    %c0_10 = arith.constant 0 : index
    %4 = vector.load %arg4[%c0_7, %c0_8, %c0_9, %c0_10] : memref<1x4x8x32xbf16, #tpu.memory_space<vmem>>, vector<1x4x8x32xbf16>
    %5 = vector.shape_cast %4 : vector<1x4x8x32xbf16> to vector<4x8x32xbf16>
    %c0_11 = arith.constant 0 : index
    %c0_12 = arith.constant 0 : index
    %c0_13 = arith.constant 0 : index
    %c0_14 = arith.constant 0 : index
    %6 = vector.load %arg5[%c0_11, %c0_12, %c0_13, %c0_14] : memref<1x1x8x8xi8, #tpu.memory_space<vmem>>, vector<1x1x8x8xi8>
    %7 = vector.shape_cast %6 : vector<1x1x8x8xi8> to vector<1x8x8xi8>
    %8 = arith.sitofp %7 : vector<1x8x8xi8> to vector<1x8x8xf32>
    %cst = arith.constant dense<0.000000e+00> : vector<4x8x8xf32>
    %9 = tpu.matmul %1, %3, %cst {dimension_numbers = #tpu.dot_dimension_numbers<[2], [2], [1], [1], [0, 0, 0, 1, 1, 1], [0], [0]>} : vector<4x8x32xbf16>, vector<4x8x32xbf16>, vector<4x8x8xf32> -> vector<4x8x8xf32>
    %cst_15 = arith.constant 0.176776692 : f32
    %10 = vector.broadcast %cst_15 : f32 to vector<4x8x8xf32>
    %11 = arith.mulf %9, %10 : vector<4x8x8xf32>
    %cst_16 = arith.constant 0.000000e+00 : f32
    %12 = vector.broadcast %cst_16 : f32 to vector<1x8x8xf32>
    %13 = arith.cmpf oeq, %8, %12 : vector<1x8x8xf32>
    %cst_17 = arith.constant -1.000000e+09 : f32
    %14 = vector.shape_cast %13 : vector<1x8x8xi1> to vector<1x8x8xi1>
    %15 = vector.broadcast %14 : vector<1x8x8xi1> to vector<4x8x8xi1>
    %16 = vector.broadcast %cst_17 : f32 to vector<4x8x8xf32>
    %17 = arith.select %15, %16, %11 : vector<4x8x8xi1>, vector<4x8x8xf32>
    %cst_18 = arith.constant dense<0xFF800000> : vector<4x8xf32>
    %18 = vector.multi_reduction <maximumf>, %17, %cst_18 [2] : vector<4x8x8xf32> to vector<4x8xf32>
    %19 = vector.shape_cast %18 : vector<4x8xf32> to vector<4x8x1xf32>
    %20 = vector.broadcast %19 : vector<4x8x1xf32> to vector<4x8x8xf32>
    %21 = arith.subf %17, %20 : vector<4x8x8xf32>
    %22 = math.exp %21 : vector<4x8x8xf32>
    %cst_19 = arith.constant dense<0.000000e+00> : vector<4x8xf32>
    %23 = vector.multi_reduction <add>, %22, %cst_19 [2] : vector<4x8x8xf32> to vector<4x8xf32>
    %24 = vector.shape_cast %23 : vector<4x8xf32> to vector<4x8x1xf32>
    %25 = tpu.reciprocal %24 {approx = true} : vector<4x8x1xf32> -> vector<4x8x1xf32>
    %26 = vector.broadcast %25 : vector<4x8x1xf32> to vector<4x8x8xf32>
    %27 = arith.mulf %22, %26 : vector<4x8x8xf32>
    %28 = arith.truncf %27 : vector<4x8x8xf32> to vector<4x8x8xbf16>
    %cst_20 = arith.constant dense<0.000000e+00> : vector<4x8x32xf32>
    %29 = tpu.matmul %28, %5, %cst_20 {dimension_numbers = #tpu.dot_dimension_numbers<[2], [1], [1], [2], [0, 0, 0, 1, 1, 2], [0], [0]>} : vector<4x8x8xbf16>, vector<4x8x32xbf16>, vector<4x8x32xf32> -> vector<4x8x32xf32>
    %c0_21 = arith.constant 0 : index
    %c0_22 = arith.constant 0 : index
    %c0_23 = arith.constant 0 : index
    %c0_24 = arith.constant 0 : index
    %30 = vector.load %arg6[%c0_21, %c0_22, %c0_23, %c0_24] : memref<1x4x8x32xf32, #tpu.memory_space<vmem>>, vector<1x4x8x32xf32>
    %31 = vector.shape_cast %30 : vector<1x4x8x32xf32> to vector<4x8x32xf32>
    %32 = vector.shape_cast %29 : vector<4x8x32xf32> to vector<1x4x8x32xf32>
    tpu.vector_store %arg6[%c0_21, %c0_22, %c0_23, %c0_24], %32 {strides = array<i32>} : memref<1x4x8x32xf32, #tpu.memory_space<vmem>>, vector<1x4x8x32xf32>,
    %c0_25 = arith.constant 0 : index
    %c0_26 = arith.constant 0 : index
    %c0_27 = arith.constant 0 : index
    %c0_28 = arith.constant 0 : index
    %33 = vector.load %arg7[%c0_25, %c0_26, %c0_27, %c0_28] : memref<1x4x8x8xf32, #tpu.memory_space<vmem>>, vector<1x4x8x8xf32>
    %34 = vector.shape_cast %33 : vector<1x4x8x8xf32> to vector<4x8x8xf32>
    %35 = vector.shape_cast %27 : vector<4x8x8xf32> to vector<1x4x8x8xf32>
    tpu.vector_store %arg7[%c0_25, %c0_26, %c0_27, %c0_28], %35 {strides = array<i32>} : memref<1x4x8x8xf32, #tpu.memory_space<vmem>>, vector<1x4x8x8xf32>,
    return
  }
  func.func @transform_0(%arg0: i32, %arg1: i32) -> (i32, i32, i32, i32) {
    %c0_i32 = arith.constant 0 : i32
    %c0_i32_0 = arith.constant 0 : i32
    %c0_i32_1 = arith.constant 0 : i32
    return %arg0, %arg1, %c0_i32, %c0_i32_0 : i32, i32, i32, i32
  }
  func.func @transform_1(%arg0: i32, %arg1: i32) -> (i32, i32, i32, i32) {
    %c0_i32 = arith.constant 0 : i32
    %c0_i32_0 = arith.constant 0 : i32
    %c0_i32_1 = arith.constant 0 : i32
    return %arg0, %arg1, %c0_i32, %c0_i32_0 : i32, i32, i32, i32
  }
  func.func @transform_2(%arg0: i32, %arg1: i32) -> (i32, i32, i32, i32) {
    %c0_i32 = arith.constant 0 : i32
    %c0_i32_0 = arith.constant 0 : i32
    %c0_i32_1 = arith.constant 0 : i32
    return %arg0, %arg1, %c0_i32, %c0_i32_0 : i32, i32, i32, i32
  }
  func.func @transform_3(%arg0: i32, %arg1: i32) -> (i32, i32, i32, i32) {
    %c0_i32 = arith.constant 0 : i32
    %c0_i32_0 = arith.constant 0 : i32
    %c0_i32_1 = arith.constant 0 : i32
    %c0_i32_2 = arith.constant 0 : i32
    %c0_i32_3 = arith.constant 0 : i32
    return %c0_i32, %c0_i32_0, %c0_i32_1, %c0_i32_2 : i32, i32, i32, i32
  }
  func.func @transform_4(%arg0: i32, %arg1: i32) -> (i32, i32, i32, i32) {
    %c0_i32 = arith.constant 0 : i32
    %c0_i32_0 = arith.constant 0 : i32
    %c0_i32_1 = arith.constant 0 : i32
    return %arg0, %arg1, %c0_i32, %c0_i32_0 : i32, i32, i32, i32
  }
  func.func @transform_5(%arg0: i32, %arg1: i32) -> (i32, i32, i32, i32) {
    %c0_i32 = arith.constant 0 : i32
    %c0_i32_0 = arith.constant 0 : i32
    %c0_i32_1 = arith.constant 0 : i32
    return %arg0, %arg1, %c0_i32, %c0_i32_0 : i32, i32, i32, i32
  }
}

</mosaic_0001>

<bundles_post_ra>
// kernel: tpu_custom_call.1
= control target key start
LH: loop header
LB: loop body
LE: loop exit
PB: predicated region body
PF: predicated region fallthrough
CT: control target
= control target key end

     0   :  { %s1429_s0 = inlined_call_operand.hbm [shape: bf16[2,4,8,32], index: 0, kind: input, shape index: {}]   ;;  %s1430_s1 = inlined_call_operand.hbm [shape: bf16[2,4,8,32], index: 1, kind: input, shape index: {}]   ;;  %s1431_s2 = inlined_call_operand.hbm [shape: bf16[2,4,8,32], index: 2, kind: input, shape index: {}]   ;;  %s1432_s3 = inlined_call_operand.vmem [shape: s8[1,1,8,8], index: 3, kind: input, shape index: {}]   ;;  %s1433_s4 = inlined_call_operand.hbm [shape: f32[2,4,8,32], index: 4, kind: output, shape index: {0}]   ;;  %s1434_s5 = inlined_call_operand.hbm [shape: f32[2,4,8,8], index: 5, kind: output, shape index: {1}]  }
   0x1   :  { %1442 = sst [smem:[#allocation22_spill]] %s1430_s1 }
   0x2   :  { %11 = vsyncpa [#allocation3], 0 }
   0x3   :  { %13 = vsyncpa [#allocation3 + $0x1], 0 }
   0x4   :  { %14 = vsyncpa [#allocation6], 0 }
   0x5   :  { %16 = vsyncpa [#allocation6 + $0x1], 0 }
   0x6   :  { %17 = vsyncpa [#allocation4], 0 }
   0x7   :  { %19 = vsyncpa [#allocation4 + $0x1], 0 }
   0x8   :  { %20 = vsyncpa [#allocation10], 0 }
   0x9   :  { %22 = vsyncpa [#allocation10 + $0x1], 0  ;;  %s1203_s18 = smov 0   ;;  %s1205_s19 = smov 0  }
   0xa   :  { %s1207_s20 = smov 0   ;;  %s1209_s21 = smov 0  }
   0xb   :  { %s1211_s22 = smov 0   ;;  %s1213_s23 = smov 0  }
   0xc LB: > { %1443 = sst [smem:[#allocation15_spill]] %s1147_s18  ;;  %s1234_s24 = sadd.s32 4294967295, %s1167_s23   ;;  %s1167_s23 = sphi %s1213_s23, %s28_s23   ;;  %s1163_s22 = sphi %s1211_s22, %s1463_s22   ;;  %s1159_s21 = sphi %s1209_s21, %s1462_s21   ;;  %s1155_s20 = sphi %s1207_s20, %s1461_s20   ;;  %s1151_s19 = sphi %s1205_s19, %s1465_s19   ;;  %s1147_s18 = sphi %s1203_s18, %s1464_s18  }
   0xd   : > { %1444 = sst [smem:[#allocation16_spill]] %s1155_s20  ;;  %s823_s25 = sadd.s32 4294967294, %s1167_s23  }
   0xe   : > { %1445 = sst [smem:[#allocation17_spill]] %s1163_s22  ;;  %s40_s26 = sadd.s32 1, %s1163_s22 }
   0xf   : > { %1446 = sst [smem:[#allocation18_spill]] %s1167_s23  ;;  %s49_s27 = sadd.s32 1, %s1155_s20 }
  0x10   : > { %p42_p0 = scmp.ge.s32.totalorder %s40_s26, 2  ;;  %p56_p1 = scmp.ne.s32.totalorder %s1155_s20, %s1151_s19 }
  0x11   : > { %p57_p2 = scmp.eq.s32.totalorder %s1167_s23, 0  ;;  %p62_p3 = scmp.ne.s32.totalorder %s1151_s19, %s1147_s18 }
  0x12   : > { %s1467_s26 = smov (%p42_p0, %s40_s26), 0  ;;  %p63_p5 = scmp.eq.s32.totalorder %s1234_s24, 0 }
  0x13   : > { %1447 = sst [smem:[#allocation19_spill]] %s1467_s26  ;;  %p1246_p4 = por %p57_p2, %p56_p1 }
  0x14   : > { %s44_s29 = ssub.s32 %s1163_s22, %s1467_s26  ;;  %p165_p6 = scmp.eq.s32.totalorder %s1234_s24, 1 }
  0x15   : > { %p47_p7 = scmp.eq.s32.totalorder %s44_s29, 0  ;;  %p1254_p8 = por %p63_p5, %p62_p3 }
  0x16   : > { %p1258_p9 = por %p165_p6, %p56_p1  ;;  %p171_p10 = scmp.eq.s32.totalorder %s823_s25, 1 }
  0x17   : > { %s1263_s7 = scalar_select %p47_p7, %s1155_s20, %s49_s27  }
  0x18   : > { %p1265_p11 = por %p171_p10, %p62_p3  ;;  %p825_p12 = scmp.ge.s32.totalorder %s1167_s23, 2 }
  0x19   : > { %1451 = sst [smem:[#allocation20_spill]] %s1263_s7  ;;  %p889_p13 = scmp.lt.s32.totalorder %s1167_s23, 2 }
  0x1a   : > { %s1452_s8 = scalar_select %p1265_p11, 1, 0 }
  0x1b   : > { %s222_s9 = sand.u32 1, %s1155_s20   ;;  %s857_s11 = sshll.u32 %s1163_s22, 4 }
  0x1c   : > { %1453 = sst [smem:[#allocation21_spill]] %s1452_s8  ;;  %s1272_s10 = sshll.u32 %s222_s9, 4 }
  0x1d   : > { %p1277_p0 = pnand %p889_p13, %p1246_p4  ;;  %s246_s13 = sand.u32 1, %s1167_s23  }
  0x1e   : > { %s1455_s1 = sld [smem:[#allocation22_spill]]  ;;  %s250_s25 = scalar_lea.vmem [#allocation5], %s1272_s10 }
  0x1f   : > { %s260_s27 = sshll.u32 %s250_s25, 4  ;;  %s247_s29 = scalar_lea.sflag [#allocation6], %s246_s13  ;;  %s261_s27 = int_to_ptr.vmem [resolvable:$true] %s260_s27 }
  0x20   : > { %s1169_s26 = smov 64   ;;  %s1170_s28 = smov 4  }
  0x21   : > { %p835_p1 = scmp.ge.s32.totalorder %s1167_s23, 1  ;;  %p292_p2 = scmp.lt.s32.totalorder %s1167_s23, 3 }
  0x22   : > { %s223_s13 = scalar_lea.sflag [#allocation3], %s222_s9  ;;  %s281_s20 = scalar_lea.hbm %s1431_s2, %s857_s11 }
  0x23   : > { %p1290_p3 = pnand %p835_p1, %p292_p2  ;;  %s282_s23 = sshll.u32 %s281_s20, 4  ;;  %s283_s23 = int_to_ptr.hbm [resolvable:$true] %s282_s23 }
  0x24   : > { %s257_s16 = scalar_lea.hbm %s1455_s1, %s857_s11  ;;  %s226_s1 = scalar_lea.vmem [#allocation2], %s1272_s10 }
  0x25   : > { %s258_s17 = sshll.u32 %s257_s16, 4  ;;  %s233_s16 = scalar_lea.hbm %s1429_s0, %s857_s11  ;;  %s259_s17 = int_to_ptr.hbm [resolvable:$true] %s258_s17 }
  0x26   : > { %878 = dma.hbm_to_vmem [thread:$0]  (!%p1277_p0), %s259_s17, 256, %s261_s27, %s247_s29, %s1169_s26, %s1169_s26, %s1170_s28  }
  0x27   : > { %s234_s25 = sshll.u32 %s233_s16, 4  ;;  %s236_s7 = sshll.u32 %s226_s1, 4  ;;  %s235_s25 = int_to_ptr.hbm [resolvable:$true] %s234_s25  ;;  %s237_s7 = int_to_ptr.vmem [resolvable:$true] %s236_s7 }
  0x28   : > { %875 = dma.hbm_to_vmem [thread:$0]  (!%p1277_p0), %s235_s25, 256, %s237_s7, %s223_s13, %s1169_s26, %s1169_s26, %s1170_s28  }
  0x29   : > { %s274_s8 = scalar_lea.vmem [#allocation7], %s1272_s10  ;;  %296 = sbr.rel (%p1290_p3) target bundleno = 598 (0x256), region = 36 }
  0x2a   : > { %s284_s18 = sshll.u32 %s274_s8, 4  ;;  %s1309_s1 = sand.u32 (!%p1290_p3), 1, %s1151_s19   ;;  %s285_s18 = int_to_ptr.vmem [resolvable:$true] %s284_s18 }
  0x2b   : > { %881 = dma.hbm_to_vmem [thread:$0]  (!%p1277_p0), %s283_s23, 256, %s285_s18, %s247_s29, %s1169_s26, %s1169_s26, %s1170_s28  }
  0x2c   : > { %s1312_s7 = sshll.u32 (!%p1290_p3), %s1309_s1, 4  ;;  %s299_s9 = scalar_lea.sflag (!%p1290_p3), [#allocation3], %s1309_s1 }
  0x2d   : > { %s302_s20 = scalar_lea.vmem (!%p1290_p3), [#allocation2], %s1312_s7 }
  0x2e   : > { %1130 = dma.done.wait (%p1254_p8), %s299_s9, 256  }
  0x2f   : > { %1132 = vsyncadd (%p1254_p8), %s299_s9, 4294967040  ;;  %s308_s18 = sand.u32 1, %s1234_s24   ;;  %s312_s23 = scalar_lea.vmem [#allocation5], %s1312_s7 }
  0x30   : > { %s309_s22 = scalar_lea.sflag [#allocation6], %s308_s18 }
  0x31   : > { %1134 = dma.done.wait (%p1254_p8), %s309_s22, 512  }
  0x32   : > { %1136 = vsyncadd (%p1254_p8), %s309_s22, 4294966784  ;;  %vm386_vm0 = vcmask 261120   ;;  %v375_v0 = vld [vmem:[%s312_s23] sm:$0xf]  ;;  %v377_v1 = vld [vmem:[%s312_s23 + $0x8] sm:$0xf] }
  0x33   : > { %v378_v2 = vld [vmem:[%s312_s23 + $0xc] sm:$0xf]  ;;  %v391_v3 = vsel %vm386_vm0, %v375_v0, 0  ;;  %v429_v4 = vsel %vm386_vm0, %v377_v1, 0  ;;  %v376_v6 = vld [vmem:[%s312_s23 + $0x4] sm:$0xf] }
  0x34   : > { %v448_v5 = vsel %vm386_vm0, %v378_v2, 0  ;;  %400 = vmatpush.bf16.xpose.msra.mxu0 %v391_v3  ;;  %438 = vmatpush.bf16.xpose.msra.mxu2 %v429_v4  ;;  %v410_v7 = vsel %vm386_vm0, %v376_v6, 0  ;;  %v371_v8 = vld [vmem:[%s302_s20] sm:$0xf]  ;;  %v373_v9 = vld [vmem:[%s302_s20 + $0x8] sm:$0xf] }
  0x35   : > { %457 = vmatpush.bf16.xpose.msra.mxu3 %v448_v5  ;;  %419 = vmatpush.bf16.xpose.msra.mxu1 %v410_v7  ;;  %v374_v10 = vld [vmem:[%s302_s20 + $0xc] sm:$0xf]  ;;  %v372_v11 = vld [vmem:[%s302_s20 + $0x4] sm:$0xf]  ;;  %v383_v12 = vld [vmem:[%s1432_s3] sm:$0x3] }
  0x36   : > { %v384_v13 = vunpack.c.0.s8 %v383_v12  ;;  %vm474_vm2 = vcmask 64512   ;;  %s322_s30 = scalar_lea.vmem [#allocation7], %s1312_s7  ;;  %vm526_vm3 = vcmask 1043456   ;;  %s839_s8 = sshll.u32 %s1309_s1, 5 }
  0x37   : > { %v379_v55 = vld [vmem:[%s322_s30] sm:$0xf]  ;;  %v381_v57 = vld [vmem:[%s322_s30 + $0x8] sm:$0xf]  ;;  %v382_v59 = vld [vmem:[%s322_s30 + $0xc] sm:$0xf] }
  0x38   : > { %v385_v14 = vcvt.s32.f32 %v384_v13  ;;  %v528_v56 = vsel %vm526_vm3, %v379_v55, 0  ;;  %v566_v58 = vsel %vm526_vm3, %v381_v57, 0  ;;  %v380_v60 = vld [vmem:[%s322_s30 + $0x4] sm:$0xf]  ;;  %v585_v61 = vsel %vm526_vm3, %v382_v59, 0  ;;  %s364_s10 = scalar_lea.vmem [#allocation9], %s839_s8 }
  0x39   : > { %v547_v62 = vsel %vm526_vm3, %v380_v60, 0  ;;  %s647_s11 = sshll.u32 %s364_s10, 4  ;;  %s860_s12 = sshll.u32 %s1159_s21, 5  ;;  %s648_s11 = int_to_ptr.vmem [resolvable:$true] %s647_s11 }
  0x3a   : > { %vm467_vm1 = vcmp.eq.f32.partialorder %v385_v14, 0.0  ;;  %s646_s14 = scalar_lea.hbm %s1434_s5, %s860_s12  ;;  %s614_s16 = scalar_lea.sflag [#allocation10], %s1309_s1 }
  0x3b   : > { %841 = vmatmul.msk.bf16.vlgmr.msra.gmra.mxu0 %vm386_vm0, %v371_v8  ;;  %843 = vmatmul.msk.bf16.vlgmr.msra.gmra.mxu2 %vm386_vm0, %v373_v9  ;;  %s649_s15 = sshll.u32 %s646_s14, 4  ;;  %s1069_s7 = scalar_lea.hbm %s1434_s5, 64  ;;  %s650_s15 = int_to_ptr.hbm [resolvable:$true] %s649_s15 }
  0x3c   : > { %844 = vmatmul.msk.bf16.vlgmr.msra.gmra.mxu3 %vm386_vm0, %v374_v10  ;;  %842 = vmatmul.msk.bf16.vlgmr.msra.gmra.mxu1 %vm386_vm0, %v372_v11  ;;  %s1063_s25 = sshra.s32 %s650_s15, 4  ;;  %s1064_s25 = int_to_ptr.hbm [resolvable:$true] %s1063_s25 }
  0x3d   : > { %537 = vmatpush.bf16.msrb.mxu0 %v528_v56  ;;  %575 = vmatpush.bf16.msrb.mxu2 %v566_v58  ;;  %s1065_s13 = scalar_lea.hbm %s1064_s25, 32  ;;  %p1070_p7 = scmp.lt.s32.totalorder %s1064_s25, %s1434_s5 }
  0x3e   : > { %594 = vmatpush.bf16.msrb.mxu3 %v585_v61  ;;  %556 = vmatpush.bf16.msrb.mxu1 %v547_v62  ;;  %p1066_p4 = scmp.ne.s32.totalorder %s1064_s25, %s1065_s13  ;;  %p1071_p8 = scmp.lt.s32.totalorder %s1069_s7, %s1065_s13 }
  0x40   : > { %p1067_p5 = pnand %p1066_p4, %p1258_p9  ;;  %p1072_p10 = por %p1071_p8, %p1070_p7 }
  0x42   : > { %p1068_p6 = pneg %p1067_p5 }
  0x44   : > { %p1073_p13 = pnand %p1072_p10, %p1068_p6 }
  0xb8   : > { %v402_v15 = vpop.f32.mrf.mxu0 }
  0xb9   : > { %v463_v16 = vmul.f32 0.17677669, %v402_v15  ;;  %v421_v17 = vpop.f32.mrf.mxu1 }
  0xba   : > { %v464_v19 = vmul.f32 0.17677669, %v421_v17 }
  0xbb   : > { %v470_v18 = vsel %vm467_vm1, -1e+09, %v463_v16 }
  0xbc   : > { %v475_v20 = vsel %vm474_vm2, %v470_v18, -inf  ;;  %v471_v24 = vsel %vm467_vm1, -1e+09, %v464_v19 }
  0xbd   : > { %476 = vmax.xlane.f32.xlu1 %v475_v20  ;;  %v478_v29 = vsel %vm474_vm2, %v471_v24, -inf }
  0xbe   : > { %v440_v21 = vpop.f32.mrf.mxu2 }
  0xbf   : > { %v465_v22 = vmul.f32 0.17677669, %v440_v21  ;;  %v459_v23 = vpop.f32.mrf.mxu3 }
  0xc0   : > { %v404_v25 = vpop.f32.mrf.mxu0  ;;  %v466_v26 = vmul.f32 0.17677669, %v459_v23 }
  0xc1   : > { %v472_v27 = vsel %vm467_vm1, -1e+09, %v465_v22  ;;  %v423_v30 = vpop.f32.mrf.mxu1 }
  0xc2   : > { %v481_v28 = vsel %vm474_vm2, %v472_v27, -inf  ;;  %v473_v31 = vsel %vm467_vm1, -1e+09, %v466_v26 }
  0xc3   : > { %482 = vmax.xlane.f32.xlu0 %v481_v28  ;;  %v484_v34 = vsel %vm474_vm2, %v473_v31, -inf }
  0xc5   : > { %479 = vmax.xlane.f32.xlu1 %v478_v29 }
  0xc6   : > { %v442_v32 = vpop.f32.mrf.mxu2 }
  0xc7   : > { %v461_v33 = vpop.f32.mrf.mxu3 }
  0xcb   : > { %485 = vmax.xlane.f32.xlu0 %v484_v34 }
 0x130   : > { %v477_v35 = vpop.xlane.xlu1 %476 }
 0x131   : > { %v487_v36 = vsub.f32 %v470_v18, %v477_v35 }
 0x133   : > { %v491_v37 = vmul.f32 1.442695, %v487_v36 }
 0x135   : > { %943 = vpow2.f32 %v491_v37 }
 0x136   : > { %v483_v38 = vpop.xlane.xlu0 %482 }
 0x137   : > { %v489_v39 = vsub.f32 %v472_v27, %v483_v38 }
 0x138   : > { %v480_v40 = vpop.xlane.xlu1 %479 }
 0x139   : > { %v495_v41 = vmul.f32 1.442695, %v489_v39  ;;  %v488_v42 = vsub.f32 %v471_v24, %v480_v40 }
 0x13b   : > { %v944_v43 = vpop.eup %943  ;;  %945 = vpow2.f32 %v495_v41  ;;  %v493_v44 = vmul.f32 1.442695, %v488_v42 }
 0x13c   : > { %v499_v45 = vsel %vm474_vm2, %v944_v43, 0.0 }
 0x13d   : > { %947 = vpow2.f32 %v493_v44  ;;  %500 = vadd.xlane.f32.xlu0 %v499_v45 }
 0x13e   : > { %v486_v46 = vpop.xlane.xlu0 %485 }
 0x13f   : > { %v490_v47 = vsub.f32 %v473_v31, %v486_v46 }
 0x141   : > { %v946_v48 = vpop.eup %945  ;;  %v497_v49 = vmul.f32 1.442695, %v490_v47 }
 0x142   : > { %v505_v50 = vsel %vm474_vm2, %v946_v48, 0.0 }
 0x143   : > { %v948_v51 = vpop.eup %947  ;;  %949 = vpow2.f32 %v497_v49  ;;  %506 = vadd.xlane.f32.xlu2 %v505_v50 }
 0x144   : > { %v502_v52 = vsel %vm474_vm2, %v948_v51, 0.0 }
 0x145   : > { %503 = vadd.xlane.f32.xlu1 %v502_v52 }
 0x149   : > { %v950_v53 = vpop.eup %949 }
 0x14a   : > { %v508_v54 = vsel %vm474_vm2, %v950_v53, 0.0 }
 0x14b   : > { %509 = vadd.xlane.f32.xlu2 %v508_v54 }
 0x1b0   : > { %v501_v63 = vpop.xlane.xlu0 %500 }
 0x1b1   : > { %951 = vrcp.f32 %v501_v63 }
 0x1b6   : > { %v507_v0 = vpop.xlane.xlu2 %506 }
 0x1b7   : > { %v952_v1 = vpop.eup %951  ;;  %953 = vrcp.f32 %v507_v0 }
 0x1b8   : > { %v515_v2 = vmul.f32 %v952_v1, %v944_v43  ;;  %v504_v3 = vpop.xlane.xlu1 %503 }
 0x1b9   : > { %955 = vrcp.f32 %v504_v3 }
 0x1ba   : > { %v519_v4 = vpack.c.bf16 %v515_v2, %v515_v2  ;;  %604 = vst.msk [vmem:[%s364_s10] sm:$0xff] %vm474_vm2, %v515_v2 }
 0x1bc   : > { %845 = vmatmul.msk.bf16.vlgmr.msrb.gmra.mxu0 %vm474_vm2, %v519_v4 }
 0x1bd   : > { %v954_v5 = vpop.eup %953 }
 0x1be   : > { %v517_v6 = vmul.f32 %v954_v5, %v946_v48  ;;  %v510_v7 = vpop.xlane.xlu2 %509 }
 0x1bf   : > { %v956_v8 = vpop.eup %955  ;;  %957 = vrcp.f32 %v510_v7 }
 0x1c0   : > { %v516_v9 = vmul.f32 %v956_v8, %v948_v51  ;;  %v521_v10 = vpack.c.bf16 %v517_v6, %v517_v6  ;;  %606 = vst.msk [vmem:[%s364_s10 + $0x10] sm:$0xff] %vm474_vm2, %v517_v6 }
 0x1c2   : > { %847 = vmatmul.msk.bf16.vlgmr.msrb.gmra.mxu2 %vm474_vm2, %v521_v10  ;;  %v520_v11 = vpack.c.bf16 %v516_v9, %v516_v9  ;;  %605 = vst.msk [vmem:[%s364_s10 + $0x8] sm:$0xff] %vm474_vm2, %v516_v9 }
 0x1c4   : > { %846 = vmatmul.msk.bf16.vlgmr.msrb.gmra.mxu1 %vm474_vm2, %v520_v11 }
 0x1c5   : > { %v958_v12 = vpop.eup %957 }
 0x1c6   : > { %v518_v13 = vmul.f32 %v958_v12, %v950_v53 }
 0x1c8   : > { %v522_v14 = vpack.c.bf16 %v518_v13, %v518_v13  ;;  %607 = vst.msk [vmem:[%s364_s10 + $0x18] sm:$0xff] %vm474_vm2, %v518_v13 }
 0x1ca   : > { %848 = vmatmul.msk.bf16.vlgmr.msrb.gmra.mxu3 %vm474_vm2, %v522_v14 }
 0x1cb   : > { %1076 = shalt.err (!%p1073_p13)
}
 0x1cc   : > { %s1171_s18 = smov 128   ;;  %s1172_s22 = smov 8  }
 0x1cd   : > { %869 = dma.vmem_to_hbm [thread:$0]  (%p1258_p9), %s648_s11, 512, %s650_s15, %s614_s16, %s1171_s18, %s1171_s18, %s1172_s22  }
 0x1ce   : > { %s357_s23 = scalar_lea.vmem [#allocation8], %s839_s8  ;;  %s627_s30 = scalar_lea.hbm %s1433_s4, %s860_s12 }
 0x1cf   : > { %s628_s10 = sshll.u32 %s357_s23, 4  ;;  %s630_s11 = sshll.u32 %s627_s30, 4  ;;  %s629_s10 = int_to_ptr.vmem [resolvable:$true] %s628_s10  ;;  %s631_s11 = int_to_ptr.hbm [resolvable:$true] %s630_s11 }
 0x1d0   : > { %s609_s8 = scalar_lea.sflag [#allocation4], %s1309_s1  ;;  %s1091_s29 = sshra.s32 %s631_s11, 4  ;;  %s1092_s29 = int_to_ptr.hbm [resolvable:$true] %s1091_s29 }
 0x1d1   : > { %s1093_s28 = scalar_lea.hbm %s1092_s29, 32  ;;  %s1097_s12 = scalar_lea.hbm %s1433_s4, 64 }
 0x1d2   : > { %p1094_p0 = scmp.ne.s32.totalorder %s1092_s29, %s1093_s28  ;;  %p1098_p3 = scmp.lt.s32.totalorder %s1092_s29, %s1433_s4 }
 0x1d3   : > { %p1099_p4 = scmp.lt.s32.totalorder %s1097_s12, %s1093_s28 }
 0x1d4   : > { %p1095_p1 = pnand %p1094_p0, %p1258_p9 }
 0x1d5   : > { %p1100_p5 = por %p1099_p4, %p1098_p3 }
 0x1d6   : > { %p1096_p2 = pneg %p1095_p1 }
 0x1d8   : > { %p1101_p6 = pnand %p1100_p5, %p1096_p2 }
 0x239   : > { %v539_v15 = vpop.f32.mrf.mxu0 }
 0x23a   : > { %600 = vst.msk [vmem:[%s357_s23] sm:$0xff] %vm386_vm0, %v539_v15 }
 0x241   : > { %v541_v16 = vpop.f32.mrf.mxu0  ;;  %v558_v17 = vpop.f32.mrf.mxu1 }
 0x242   : > { %601 = vst.msk [vmem:[%s357_s23 + $0x8] sm:$0xff] %vm386_vm0, %v558_v17 }
 0x245   : > { %v577_v18 = vpop.f32.mrf.mxu2 }
 0x246   : > { %602 = vst.msk [vmem:[%s357_s23 + $0x10] sm:$0xff] %vm386_vm0, %v577_v18 }
 0x249   : > { %v560_v19 = vpop.f32.mrf.mxu1 }
 0x24d   : > { %v579_v20 = vpop.f32.mrf.mxu2  ;;  %v596_v21 = vpop.f32.mrf.mxu3 }
 0x24e   : > { %603 = vst.msk [vmem:[%s357_s23 + $0x18] sm:$0xff] %vm386_vm0, %v596_v21 }
 0x24f   : > { %1104 = shalt.err (!%p1101_p6)
}
 0x250   : > { %868 = dma.vmem_to_hbm [thread:$0]  (%p1258_p9), %s629_s10, 512, %s631_s11, %s609_s8, %s1171_s18, %s1171_s18, %s1172_s22  }
 0x255   : > { %v598_v22 = vpop.f32.mrf.mxu3 }
 0x256 PF: > { %s1457_s1 = sld [smem:[#allocation15_spill]]  ;;  %p883_p7 = pnand %p825_p12, %p1265_p11 }
 0x257   : > { %s1459_s13 = sld [smem:[#allocation18_spill]] }
 0x258   : > { %p884_p8 = pneg %p883_p7 }
 0x25c   : > { %s664_s17 = sand.u32 1, %s1457_s1  }
 0x25d   : > { %s665_s27 = scalar_lea.sflag [#allocation4], %s664_s17 }
 0x25e   : > { %1138 = dma.done.wait (%p884_p8), %s665_s27, 512  }
 0x25f   : > { %1140 = vsyncadd (%p884_p8), %s665_s27, 4294966784  ;;  %s675_s7 = scalar_lea.sflag [#allocation10], %s664_s17 }
 0x260   : > { %1142 = dma.done.wait (%p884_p8), %s675_s7, 512  }
 0x261   : > { %1144 = vsyncadd (%p884_p8), %s675_s7, 4294966784  ;;  %s28_s23 = sadd.s32 1, %s1459_s13   ;;  %s1460_s6 = sld [smem:[#allocation16_spill]] }
 0x262   : > { %p25_p10 = scmp.ge.s32.totalorder %s28_s23, 4   ;;  %s1461_s20 = sld [smem:[#allocation20_spill]] }
 0x263   : > { %s1462_s21 = sld [smem:[#allocation17_spill]]  ;;  %s1464_s18 = smov %s1151_s19 }
 0x264   : > { %s1463_s22 = sld [smem:[#allocation19_spill]]  ;;  %27 = sbr.rel (!%p25_p10) target bundleno = 12 (0xc), region = 122 }
 0x267   : > { %s1465_s19 = smov %s1460_s6 }
 0x269   :  { %681 = vsyncpa [#allocation3], 1 }
 0x26a   :  { %683 = vsyncpa [#allocation3 + $0x1], 1 }
 0x26b   :  { %684 = vsyncpa [#allocation6], 1 }
 0x26c   :  { %686 = vsyncpa [#allocation6 + $0x1], 1 }
 0x26d   :  { %687 = vsyncpa [#allocation4], 1 }
 0x26e   :  { %689 = vsyncpa [#allocation4 + $0x1], 1 }
 0x26f   :  { %690 = vsyncpa [#allocation10], 1 }
 0x270   :  { %692 = vsyncpa [#allocation10 + $0x1], 1 }

</bundles_post_ra>
